<compile_context>
chip_gen: v6e
topology: v6e:2x2x1
jax: 0.10.0
libtpu: 0.0.40
codegen_flags: <defaults>
</compile_context>

<pallas_src>
import functools

import jax
import jax.numpy as jnp
import numpy as np
from jax import lax
from jax.experimental import pallas as pl
from jax.experimental.pallas import tpu as pltpu

STEP_SIZE = 0.001


def _round_up(x, m):
    return ((x + m - 1) // m) * m


def _cdiv(a, b):
    return (a + b - 1) // b


def _choose_tb(B):
    """Batch tile: multiple of 8, <= 512, and grid >= 2 once B > 256 (v7x: 2 TCs)."""
    B8 = _round_up(B, 8)
    if B8 <= 256:
        return B8
    n_tiles = max(2, _cdiv(B8, 512))
    return _round_up(_cdiv(B8, n_tiles), 8)


def _vmem_bytes(TB, Dp, Hp, *, hoist_bcast, single_buf_w):
    """Rough resident-VMEM estimate for one grid step."""
    wrep = 1 if single_buf_w else 2
    est = (
        2 * 2 * TB * Dp * 4            # x tile + out tile, double-buffered, f32
        + wrep * 2 * Dp * Hp * 2       # W1 + W1^T, bf16
        + wrep * 2 * 8 * Hp * 4        # b1 + step*rowsum(W2) (sublane-padded)
        + 3 * TB * Hp * 4              # h / a / dy_dh temporaries (f32)
        + TB * Hp * 2 + TB * Dp * 2    # bf16 casts of dy_dh and x
    )
    if hoist_bcast:
        est += 2 * TB * Hp * 4         # materialized (TB, Hp) broadcasts
    return est


def _langevin_kernel(x_ref, w1_ref, w1t_ref, b1_ref, w2s_ref, o_ref, *,
                     num_iter, hoist_bcast):
    """Full Langevin loop for one batch tile.

    x_ref   : (TB, Dp) f32   input tile (lane-padded features)
    w1_ref  : (Dp, Hp) bf16  first-layer weight (zero-padded)
    w1t_ref : (Hp, Dp) bf16  pre-transposed W1 (transposed once in the wrapper)
    b1_ref  : (1, Hp)  f32   first-layer bias (zero-padded)
    w2s_ref : (1, Hp)  f32   rowsum(W2) * STEP_SIZE (zero-padded)
    o_ref   : (TB, Dp) f32   output tile (aliases the input buffer)
    """
    TB = x_ref.shape[0]
    Hp = w1_ref.shape[1]

    w1 = w1_ref[...]     # (Dp, Hp) bf16
    w1t = w1t_ref[...]   # (Hp, Dp) bf16
    if hoist_bcast:
        # Small tiles: hoist broadcasts (JAX does not CSE broadcast_in_dim).
        b1 = jnp.broadcast_to(b1_ref[...], (TB, Hp))
        w2s = jnp.broadcast_to(w2s_ref[...], (TB, Hp))
    else:
        # Big tiles: keep (1, Hp) operands; per-iter re-broadcast is VPU filler
        # hidden under the MXU and saves 2*TB*Hp*4 bytes of live VMEM.
        b1 = b1_ref[...]
        w2s = w2s_ref[...]

    def body(_, x):
        # MXU in bf16, accumulate in f32; x carry and VPU math stay f32.
        h = jnp.dot(x.astype(jnp.bfloat16), w1,
                    preferred_element_type=jnp.float32) + b1       # (TB, Hp)
        a = jnp.tanh(h)                                            # EUP
        dy_dh = (1.0 - a * a) * w2s                                # pre-scaled by step_size
        g = jnp.dot(dy_dh.astype(jnp.bfloat16), w1t,
                    preferred_element_type=jnp.float32)            # (TB, Dp)
        return x + g

    unroll = True if num_iter <= 16 else 4   # partial unroll keeps LLO visibility
    o_ref[...] = lax.fori_loop(0, num_iter, body, x_ref[...], unroll=unroll)


@functools.partial(jax.jit, static_argnames=("num_iter",))
def fake_langevin(x, w1, b1, w2, num_iter):
    """Pallas-backed equivalent of TorchFakeLangevin.forward(x, num_iter)."""
    B, D = x.shape
    H = w1.shape[1]

    Dp = _round_up(D, 128)     # lane-dense features (no masked vst)
    Hp = _round_up(H, 128)     # lane-dense hidden dim (full MXU N)

    # --- per-chip VMEM budget (v7x 64 MiB, v5e/v6e 128 MiB) with headroom ---
    try:
        vmem_cap = int(pltpu.get_tpu_info().vmem_capacity_bytes)
    except Exception:  # pragma: no cover - conservative fallback
        vmem_cap = 64 * 1024 * 1024
    vmem_budget = max(vmem_cap - 8 * 1024 * 1024, 16 * 1024 * 1024)

    # Single-buffer the constant-index weights only when they are big enough
    # to matter (avoids exercising pipeline_mode for tiny demo weights).
    single_buf_w = 2 * Dp * Hp * 2 > (4 << 20)

    def _hoist(tb):
        return 2 * tb * Hp * 4 <= (2 << 20)

    TB = _choose_tb(B)
    while TB > 8 and _vmem_bytes(TB, Dp, Hp, hoist_bcast=_hoist(TB),
                                 single_buf_w=single_buf_w) > vmem_budget:
        TB = max(8, _round_up(TB // 2, 8))   # shrink instead of hoping
    hoist_bcast = _hoist(TB)
    Bp = _round_up(B, TB)

    # --- operands.  Zero-padding is exact: padded feature lanes of x stay zero
    # (their W1^T columns are zero), padded hidden units contribute nothing
    # (their rowsum is zero), padded batch rows are sliced off at the end. ---
    xf = x.astype(jnp.float32)
    w1f = w1.astype(jnp.float32)
    b1f = b1.astype(jnp.float32).reshape(1, H)
    # grad depends on W2 only through its row sums (b2 drops out); step_size is
    # linear, so fold it in here — both exact.
    w2s = (jnp.sum(w2.astype(jnp.float32), axis=1) * STEP_SIZE).reshape(1, H)

    if Bp != B or Dp != D:
        x_p = jnp.pad(xf, ((0, Bp - B), (0, Dp - D)))
    else:
        x_p = xf                                   # fast path: no extra HBM pass
    if Dp != D or Hp != H:
        w1_p = jnp.pad(w1f, ((0, Dp - D), (0, Hp - H)))
    else:
        w1_p = w1f
    if Hp != H:
        b1_p = jnp.pad(b1f, ((0, 0), (0, Hp - H)))
        w2s_p = jnp.pad(w2s, ((0, 0), (0, Hp - H)))
    else:
        b1_p, w2s_p = b1f, w2s

    w1_bf = w1_p.astype(jnp.bfloat16)          # (Dp, Hp)
    w1t_bf = w1_p.T.astype(jnp.bfloat16)       # (Hp, Dp) — transposed ONCE here

    kernel = functools.partial(_langevin_kernel, num_iter=num_iter,
                               hoist_bcast=hoist_bcast)

    est = _vmem_bytes(TB, Dp, Hp, hoist_bcast=hoist_bcast,
                      single_buf_w=single_buf_w)
    vmem_limit = int(min(max(2 * est, 32 * 1024 * 1024), vmem_budget))

    wkw = {"pipeline_mode": pl.Buffered(1)} if single_buf_w else {}

    cost = pl.CostEstimate(
        flops=int(num_iter) * 4 * Bp * Dp * Hp,          # two matmuls / iter
        transcendentals=int(num_iter) * Bp * Hp,          # tanh
        bytes_accessed=2 * 4 * Bp * Dp + 2 * 2 * Dp * Hp + 2 * 4 * Hp,
    )

    out = pl.pallas_call(
        kernel,
        out_shape=jax.ShapeDtypeStruct((Bp, Dp), jnp.float32),
        grid=(Bp // TB,),
        in_specs=[
            pl.BlockSpec((TB, Dp), lambda i: (i, 0)),          # x tile
            pl.BlockSpec((Dp, Hp), lambda i: (0, 0), **wkw),   # W1 (bf16)
            pl.BlockSpec((Hp, Dp), lambda i: (0, 0), **wkw),   # W1^T (bf16)
            pl.BlockSpec((1, Hp), lambda i: (0, 0), **wkw),    # b1
            pl.BlockSpec((1, Hp), lambda i: (0, 0), **wkw),    # step*rowsum(W2)
        ],
        out_specs=pl.BlockSpec((TB, Dp), lambda i: (i, 0)),
        input_output_aliases={0: 0},                           # in-place x update
        compiler_params=pltpu.CompilerParams(
            dimension_semantics=("parallel",),
            vmem_limit_bytes=vmem_limit),
        cost_estimate=cost,
    )(x_p, w1_bf, w1t_bf, b1_p, w2s_p)

    if Bp != B or Dp != D:
        out = out[:B, :D]
    return out


def _reference(x, w1, b1, w2, b2, num_iter):
    """Pure-JAX reference mirroring the PyTorch autograd loop (f32)."""
    def net_sum(xx):
        return jnp.sum(jnp.tanh(xx @ w1 + b1) @ w2 + b2)

    g = jax.grad(net_sum)
    for _ in range(num_iter):
        x = x + g(x) * STEP_SIZE
    return x


if __name__ == "__main__":
    B, D, H, O = 8, 32, 32, 8
    NUM_ITER = 5

    key = jax.random.PRNGKey(0)
    kx, k1, k2, k3, k4 = jax.random.split(key, 5)
    x = jax.random.normal(kx, (B, D), dtype=jnp.float32)
    w1 = jax.random.normal(k1, (D, H), dtype=jnp.float32) * 0.1
    b1 = jax.random.normal(k2, (H,), dtype=jnp.float32) * 0.1
    w2 = jax.random.normal(k3, (H, O), dtype=jnp.float32) * 0.1
    b2 = jax.random.normal(k4, (O,), dtype=jnp.float32) * 0.1

    out = jax.block_until_ready(fake_langevin(x, w1, b1, w2, NUM_ITER))

    ref = _reference(x, w1, b1, w2, b2, NUM_ITER)
    # bf16 MXU inputs with f32 accumulation: per-step error is << 1e-5 at these
    # scales; 1e-4 keeps ample margin while still catching a missed iteration.
    np.testing.assert_allclose(np.asarray(out), np.asarray(ref),
                               rtol=1e-4, atol=1e-4)

    print("KERNEL_OK")
</pallas_src>

<mosaic_0001>
module attributes {stable_mosaic.version = 11 : i64} {
  func.func @_langevin_kernel(%arg0: i32, %arg1: memref<8x128xf32, #tpu.memory_space<vmem>>, %arg2: memref<128x128xbf16, #tpu.memory_space<vmem>>, %arg3: memref<128x128xbf16, #tpu.memory_space<vmem>>, %arg4: memref<1x128xf32, #tpu.memory_space<vmem>>, %arg5: memref<1x128xf32, #tpu.memory_space<vmem>>, %arg6: memref<8x128xf32, #tpu.memory_space<vmem>>) attributes {dimension_semantics = [#tpu.dimension_semantics<parallel>], iteration_bounds = array<i64: 1>, scalar_prefetch = 0 : i64, scratch_operands = 0 : i64, tpu.core_type = #tpu.core_type<tc>, window_params = [{transform_indices = @transform_0, window_bounds = array<i64: 8, 128>}, {pipeline_mode = #tpu.pipeline_mode<synchronous>, transform_indices = @transform_1, window_bounds = array<i64: 128, 128>}, {pipeline_mode = #tpu.pipeline_mode<synchronous>, transform_indices = @transform_2, window_bounds = array<i64: 128, 128>}, {pipeline_mode = #tpu.pipeline_mode<synchronous>, transform_indices = @transform_3, window_bounds = array<i64: 1, 128>}, {pipeline_mode = #tpu.pipeline_mode<synchronous>, transform_indices = @transform_4, window_bounds = array<i64: 1, 128>}, {transform_indices = @transform_5, window_bounds = array<i64: 8, 128>}]} {
    %c0 = arith.constant 0 : index
    %c0_0 = arith.constant 0 : index
    %0 = vector.load %arg2[%c0, %c0_0] : memref<128x128xbf16, #tpu.memory_space<vmem>>, vector<128x128xbf16>
    %c0_1 = arith.constant 0 : index
    %c0_2 = arith.constant 0 : index
    %1 = vector.load %arg3[%c0_1, %c0_2] : memref<128x128xbf16, #tpu.memory_space<vmem>>, vector<128x128xbf16>
    %c0_3 = arith.constant 0 : index
    %c0_4 = arith.constant 0 : index
    %2 = vector.load %arg4[%c0_3, %c0_4] : memref<1x128xf32, #tpu.memory_space<vmem>>, vector<1x128xf32>
    %3 = vector.shape_cast %2 : vector<1x128xf32> to vector<1x128xf32>
    %4 = vector.broadcast %3 : vector<1x128xf32> to vector<8x128xf32>
    %c0_5 = arith.constant 0 : index
    %c0_6 = arith.constant 0 : index
    %5 = vector.load %arg5[%c0_5, %c0_6] : memref<1x128xf32, #tpu.memory_space<vmem>>, vector<1x128xf32>
    %6 = vector.shape_cast %5 : vector<1x128xf32> to vector<1x128xf32>
    %7 = vector.broadcast %6 : vector<1x128xf32> to vector<8x128xf32>
    %c0_7 = arith.constant 0 : index
    %c0_8 = arith.constant 0 : index
    %8 = vector.load %arg1[%c0_7, %c0_8] : memref<8x128xf32, #tpu.memory_space<vmem>>, vector<8x128xf32>
    %c0_i32 = arith.constant 0 : i32
    %9 = arith.truncf %8 : vector<8x128xf32> to vector<8x128xbf16>
    %cst = arith.constant dense<0.000000e+00> : vector<8x128xf32>
    %10 = tpu.matmul %9, %0, %cst {dimension_numbers = #tpu.dot_dimension_numbers<[1], [0], [0], [1], [0, 0, 1, 1], [], []>} : vector<8x128xbf16>, vector<128x128xbf16>, vector<8x128xf32> -> vector<8x128xf32>
    %11 = arith.addf %10, %4 : vector<8x128xf32>
    %12 = math.tanh %11 : vector<8x128xf32>
    %13 = arith.mulf %12, %12 : vector<8x128xf32>
    %cst_9 = arith.constant 1.000000e+00 : f32
    %14 = vector.broadcast %cst_9 : f32 to vector<8x128xf32>
    %15 = arith.subf %14, %13 : vector<8x128xf32>
    %16 = arith.mulf %15, %7 : vector<8x128xf32>
    %17 = arith.truncf %16 : vector<8x128xf32> to vector<8x128xbf16>
    %cst_10 = arith.constant dense<0.000000e+00> : vector<8x128xf32>
    %18 = tpu.matmul %17, %1, %cst_10 {dimension_numbers = #tpu.dot_dimension_numbers<[1], [0], [0], [1], [0, 0, 1, 1], [], []>} : vector<8x128xbf16>, vector<128x128xbf16>, vector<8x128xf32> -> vector<8x128xf32>
    %19 = arith.addf %8, %18 : vector<8x128xf32>
    %c1_i32 = arith.constant 1 : i32
    %20 = arith.truncf %19 : vector<8x128xf32> to vector<8x128xbf16>
    %cst_11 = arith.constant dense<0.000000e+00> : vector<8x128xf32>
    %21 = tpu.matmul %20, %0, %cst_11 {dimension_numbers = #tpu.dot_dimension_numbers<[1], [0], [0], [1], [0, 0, 1, 1], [], []>} : vector<8x128xbf16>, vector<128x128xbf16>, vector<8x128xf32> -> vector<8x128xf32>
    %22 = arith.addf %21, %4 : vector<8x128xf32>
    %23 = math.tanh %22 : vector<8x128xf32>
    %24 = arith.mulf %23, %23 : vector<8x128xf32>
    %cst_12 = arith.constant 1.000000e+00 : f32
    %25 = vector.broadcast %cst_12 : f32 to vector<8x128xf32>
    %26 = arith.subf %25, %24 : vector<8x128xf32>
    %27 = arith.mulf %26, %7 : vector<8x128xf32>
    %28 = arith.truncf %27 : vector<8x128xf32> to vector<8x128xbf16>
    %cst_13 = arith.constant dense<0.000000e+00> : vector<8x128xf32>
    %29 = tpu.matmul %28, %1, %cst_13 {dimension_numbers = #tpu.dot_dimension_numbers<[1], [0], [0], [1], [0, 0, 1, 1], [], []>} : vector<8x128xbf16>, vector<128x128xbf16>, vector<8x128xf32> -> vector<8x128xf32>
    %30 = arith.addf %19, %29 : vector<8x128xf32>
    %c2_i32 = arith.constant 2 : i32
    %31 = arith.truncf %30 : vector<8x128xf32> to vector<8x128xbf16>
    %cst_14 = arith.constant dense<0.000000e+00> : vector<8x128xf32>
    %32 = tpu.matmul %31, %0, %cst_14 {dimension_numbers = #tpu.dot_dimension_numbers<[1], [0], [0], [1], [0, 0, 1, 1], [], []>} : vector<8x128xbf16>, vector<128x128xbf16>, vector<8x128xf32> -> vector<8x128xf32>
    %33 = arith.addf %32, %4 : vector<8x128xf32>
    %34 = math.tanh %33 : vector<8x128xf32>
    %35 = arith.mulf %34, %34 : vector<8x128xf32>
    %cst_15 = arith.constant 1.000000e+00 : f32
    %36 = vector.broadcast %cst_15 : f32 to vector<8x128xf32>
    %37 = arith.subf %36, %35 : vector<8x128xf32>
    %38 = arith.mulf %37, %7 : vector<8x128xf32>
    %39 = arith.truncf %38 : vector<8x128xf32> to vector<8x128xbf16>
    %cst_16 = arith.constant dense<0.000000e+00> : vector<8x128xf32>
    %40 = tpu.matmul %39, %1, %cst_16 {dimension_numbers = #tpu.dot_dimension_numbers<[1], [0], [0], [1], [0, 0, 1, 1], [], []>} : vector<8x128xbf16>, vector<128x128xbf16>, vector<8x128xf32> -> vector<8x128xf32>
    %41 = arith.addf %30, %40 : vector<8x128xf32>
    %c3_i32 = arith.constant 3 : i32
    %42 = arith.truncf %41 : vector<8x128xf32> to vector<8x128xbf16>
    %cst_17 = arith.constant dense<0.000000e+00> : vector<8x128xf32>
    %43 = tpu.matmul %42, %0, %cst_17 {dimension_numbers = #tpu.dot_dimension_numbers<[1], [0], [0], [1], [0, 0, 1, 1], [], []>} : vector<8x128xbf16>, vector<128x128xbf16>, vector<8x128xf32> -> vector<8x128xf32>
    %44 = arith.addf %43, %4 : vector<8x128xf32>
    %45 = math.tanh %44 : vector<8x128xf32>
    %46 = arith.mulf %45, %45 : vector<8x128xf32>
    %cst_18 = arith.constant 1.000000e+00 : f32
    %47 = vector.broadcast %cst_18 : f32 to vector<8x128xf32>
    %48 = arith.subf %47, %46 : vector<8x128xf32>
    %49 = arith.mulf %48, %7 : vector<8x128xf32>
    %50 = arith.truncf %49 : vector<8x128xf32> to vector<8x128xbf16>
    %cst_19 = arith.constant dense<0.000000e+00> : vector<8x128xf32>
    %51 = tpu.matmul %50, %1, %cst_19 {dimension_numbers = #tpu.dot_dimension_numbers<[1], [0], [0], [1], [0, 0, 1, 1], [], []>} : vector<8x128xbf16>, vector<128x128xbf16>, vector<8x128xf32> -> vector<8x128xf32>
    %52 = arith.addf %41, %51 : vector<8x128xf32>
    %c4_i32 = arith.constant 4 : i32
    %53 = arith.truncf %52 : vector<8x128xf32> to vector<8x128xbf16>
    %cst_20 = arith.constant dense<0.000000e+00> : vector<8x128xf32>
    %54 = tpu.matmul %53, %0, %cst_20 {dimension_numbers = #tpu.dot_dimension_numbers<[1], [0], [0], [1], [0, 0, 1, 1], [], []>} : vector<8x128xbf16>, vector<128x128xbf16>, vector<8x128xf32> -> vector<8x128xf32>
    %55 = arith.addf %54, %4 : vector<8x128xf32>
    %56 = math.tanh %55 : vector<8x128xf32>
    %57 = arith.mulf %56, %56 : vector<8x128xf32>
    %cst_21 = arith.constant 1.000000e+00 : f32
    %58 = vector.broadcast %cst_21 : f32 to vector<8x128xf32>
    %59 = arith.subf %58, %57 : vector<8x128xf32>
    %60 = arith.mulf %59, %7 : vector<8x128xf32>
    %61 = arith.truncf %60 : vector<8x128xf32> to vector<8x128xbf16>
    %cst_22 = arith.constant dense<0.000000e+00> : vector<8x128xf32>
    %62 = tpu.matmul %61, %1, %cst_22 {dimension_numbers = #tpu.dot_dimension_numbers<[1], [0], [0], [1], [0, 0, 1, 1], [], []>} : vector<8x128xbf16>, vector<128x128xbf16>, vector<8x128xf32> -> vector<8x128xf32>
    %63 = arith.addf %52, %62 : vector<8x128xf32>
    %c0_23 = arith.constant 0 : index
    %c0_24 = arith.constant 0 : index
    %64 = vector.load %arg6[%c0_23, %c0_24] : memref<8x128xf32, #tpu.memory_space<vmem>>, vector<8x128xf32>
    tpu.vector_store %arg6[%c0_23, %c0_24], %63 {strides = array<i32>} : memref<8x128xf32, #tpu.memory_space<vmem>>, vector<8x128xf32>,
    return
  }
  func.func @transform_0(%arg0: i32) -> (i32, i32) {
    %c0_i32 = arith.constant 0 : i32
    %c0_i32_0 = arith.constant 0 : i32
    return %arg0, %c0_i32 : i32, i32
  }
  func.func @transform_1(%arg0: i32) -> (i32, i32) {
    %c0_i32 = arith.constant 0 : i32
    %c0_i32_0 = arith.constant 0 : i32
    %c0_i32_1 = arith.constant 0 : i32
    return %c0_i32, %c0_i32_0 : i32, i32
  }
  func.func @transform_2(%arg0: i32) -> (i32, i32) {
    %c0_i32 = arith.constant 0 : i32
    %c0_i32_0 = arith.constant 0 : i32
    %c0_i32_1 = arith.constant 0 : i32
    return %c0_i32, %c0_i32_0 : i32, i32
  }
  func.func @transform_3(%arg0: i32) -> (i32, i32) {
    %c0_i32 = arith.constant 0 : i32
    %c0_i32_0 = arith.constant 0 : i32
    %c0_i32_1 = arith.constant 0 : i32
    return %c0_i32, %c0_i32_0 : i32, i32
  }
  func.func @transform_4(%arg0: i32) -> (i32, i32) {
    %c0_i32 = arith.constant 0 : i32
    %c0_i32_0 = arith.constant 0 : i32
    %c0_i32_1 = arith.constant 0 : i32
    return %c0_i32, %c0_i32_0 : i32, i32
  }
  func.func @transform_5(%arg0: i32) -> (i32, i32) {
    %c0_i32 = arith.constant 0 : i32
    %c0_i32_0 = arith.constant 0 : i32
    return %arg0, %c0_i32 : i32, i32
  }
}

</mosaic_0001>

<bundles_post_ra>
// kernel: fake_langevin.1
= control target key start
LH: loop header
LB: loop body
LE: loop exit
PB: predicated region body
PF: predicated region fallthrough
CT: control target
= control target key end

     0   :  { %v940_v0 = vmov 0.0   ;;  %vm941_vm0 = vmmov 0   ;;  %s1263_s1 = inlined_call_operand.vmem [shape: bf16[128,128], index: 1, kind: input, shape index: {}]   ;;  %s1264_s2 = inlined_call_operand.vmem [shape: bf16[128,128], index: 2, kind: input, shape index: {}]   ;;  %s1265_s0 = inlined_call_operand.vmem [shape: f32[8,128], index: 0, kind: input, shape index: {}, may-alias: {0,5}]   ;;  %s1266_s3 = inlined_call_operand.vmem [shape: f32[1,128], index: 3, kind: input, shape index: {}]   ;;  %s1267_s4 = inlined_call_operand.vmem [shape: f32[1,128], index: 4, kind: input, shape index: {}]   ;;  %s1268_s5 = inlined_call_operand.vmem [shape: f32[8,128], index: 5, kind: output, shape index: {}, may-alias: {0,5}]  }
   0x1   :  { %712 = vmatprep.subr.bf16.mxu0 %v940_v0  ;;  %v976_v1 = vld [vmem:[%s1263_s1 + $0x38] sm:$0xff]   ;;  %728 = vmatprep.mubr.msk.bf16.mxu0 %vm941_vm0, %v940_v0  ;;  %v987_v2 = vld [vmem:[%s1263_s1 + $0x30] sm:$0xff]   ;;  %v994_v3 = vld [vmem:[%s1263_s1 + $0x28] sm:$0xff]  }
   0x2   :  { %732 = vmatprep.subr.bf16.mxu1 %v940_v0  ;;  %748 = vmatprep.mubr.msk.bf16.mxu1 %vm941_vm0, %v940_v0  ;;  %v1000_v4 = vld [vmem:[%s1264_s2 + $0x38] sm:$0xff]   ;;  %v1006_v5 = vld [vmem:[%s1263_s1 + $0x20] sm:$0xff]   ;;  %v1011_v6 = vld [vmem:[%s1264_s2 + $0x30] sm:$0xff]  }
   0x3   :  { %713 = vmatpush3.bf16.msra.mxu0 %v976_v1  ;;  %733 = vmatpush3.bf16.msra.mxu1 %v1000_v4  ;;  %v1020_v7 = vld [vmem:[%s1263_s1 + $0x18] sm:$0xff]   ;;  %v1029_v8 = vld [vmem:[%s1263_s1 + $0x10] sm:$0xff]   ;;  %v1036_v9 = vld [vmem:[%s1263_s1 + $0x8] sm:$0xff]  }
   0x4   :  { %714 = vmatprep.subr.bf16.mxu0 %v940_v0  ;;  %734 = vmatprep.subr.bf16.mxu1 %v940_v0  ;;  %v1043_v10 = vld [vmem:[%s1263_s1] sm:$0xff]   ;;  %v1076_v13 = vld [vmem:[%s1264_s2 + $0x28] sm:$0xff]   ;;  %v1090_v15 = vld [vmem:[%s1264_s2 + $0x18] sm:$0xff]  }
   0x5   :  { %v1048_v11 = vld [vmem:[%s1265_s0] sm:$0xff]  ;;  %v1097_v16 = vld [vmem:[%s1264_s2 + $0x10] sm:$0xff]   ;;  %v1104_v17 = vld [vmem:[%s1264_s2 + $0x8] sm:$0xff]  }
   0x6   :  { %v68_v12 = vpack.c.bf16 %v1048_v11, %v1048_v11  ;;  %v1083_v14 = vld [vmem:[%s1264_s2 + $0x20] sm:$0xff]  }
   0x7   :  { %715 = vmatpush3.bf16.msra.mxu0 %v987_v2  ;;  %735 = vmatpush3.bf16.msra.mxu1 %v1011_v6  ;;  %v1111_v18 = vld [vmem:[%s1264_s2] sm:$0xff]  }
   0x8   :  { %716 = vmatprep.subr.bf16.mxu0 %v940_v0  ;;  %736 = vmatprep.subr.bf16.mxu1 %v940_v0  ;;  %v1118_v19 = vld [vmem:[%s1266_s3] ss:$0 sm:$0xff] }
   0x9   :  { %v1124_v27 = vld [vmem:[%s1267_s4] ss:$0 sm:$0xff] }
   0xb   :  { %717 = vmatpush3.bf16.msra.mxu0 %v994_v3  ;;  %737 = vmatpush3.bf16.msra.mxu1 %v1076_v13 }
   0xc   :  { %718 = vmatprep.subr.bf16.mxu0 %v940_v0  ;;  %738 = vmatprep.subr.bf16.mxu1 %v940_v0 }
   0xf   :  { %719 = vmatpush3.bf16.msra.mxu0 %v1006_v5  ;;  %739 = vmatpush3.bf16.msra.mxu1 %v1083_v14 }
  0x10   :  { %720 = vmatprep.subr.bf16.mxu0 %v940_v0  ;;  %740 = vmatprep.subr.bf16.mxu1 %v940_v0 }
  0x13   :  { %721 = vmatpush3.bf16.msra.mxu0 %v1020_v7  ;;  %741 = vmatpush3.bf16.msra.mxu1 %v1090_v15 }
  0x14   :  { %722 = vmatprep.subr.bf16.mxu0 %v940_v0  ;;  %742 = vmatprep.subr.bf16.mxu1 %v940_v0 }
  0x17   :  { %723 = vmatpush3.bf16.msra.mxu0 %v1029_v8  ;;  %743 = vmatpush3.bf16.msra.mxu1 %v1097_v16 }
  0x18   :  { %724 = vmatprep.subr.bf16.mxu0 %v940_v0  ;;  %744 = vmatprep.subr.bf16.mxu1 %v940_v0 }
  0x1b   :  { %725 = vmatpush3.bf16.msra.mxu0 %v1036_v9  ;;  %745 = vmatpush3.bf16.msra.mxu1 %v1104_v17 }
  0x1c   :  { %726 = vmatprep.subr.bf16.mxu0 %v940_v0  ;;  %746 = vmatprep.subr.bf16.mxu1 %v940_v0 }
  0x1f   :  { %727 = vmatpush3.bf16.msra.mxu0 %v1043_v10  ;;  %747 = vmatpush3.bf16.msra.mxu1 %v1111_v18 }
  0x20   :  { %752 = vmatprep.subr.bf16.mxu0 %v940_v0  ;;  %772 = vmatprep.subr.bf16.mxu1 %v940_v0 }
  0x22   :  { %729 = vmatmul.mubr.bf16.vlgmr.msra.gmra.mxu0 %v68_v12 }
  0x23   :  { %753 = vmatpush3.bf16.msra.mxu0 %v976_v1  ;;  %768 = vmatprep.mubr.msk.bf16.mxu0 %vm941_vm0, %v940_v0 }
  0x24   :  { %754 = vmatprep.subr.bf16.mxu0 %v940_v0 }
  0x27   :  { %755 = vmatpush3.bf16.msra.mxu0 %v987_v2 }
  0x28   :  { %756 = vmatprep.subr.bf16.mxu0 %v940_v0 }
  0x2b   :  { %757 = vmatpush3.bf16.msra.mxu0 %v994_v3 }
  0x2c   :  { %758 = vmatprep.subr.bf16.mxu0 %v940_v0 }
  0x2f   :  { %759 = vmatpush3.bf16.msra.mxu0 %v1006_v5 }
  0x30   :  { %760 = vmatprep.subr.bf16.mxu0 %v940_v0 }
  0x33   :  { %761 = vmatpush3.bf16.msra.mxu0 %v1020_v7 }
  0x34   :  { %762 = vmatprep.subr.bf16.mxu0 %v940_v0 }
  0x37   :  { %763 = vmatpush3.bf16.msra.mxu0 %v1029_v8 }
  0x38   :  { %764 = vmatprep.subr.bf16.mxu0 %v940_v0 }
  0x3b   :  { %765 = vmatpush3.bf16.msra.mxu0 %v1036_v9 }
  0x3c   :  { %766 = vmatprep.subr.bf16.mxu0 %v940_v0 }
  0x3f   :  { %767 = vmatpush3.bf16.msra.mxu0 %v1043_v10 }
  0x40   :  { %792 = vmatprep.subr.bf16.mxu0 %v940_v0 }
  0xe2   :  { %v151_v20 = vpop.f32.mrf.mxu0 }
  0xe3   :  { %v152_v21 = vadd.f32 %v1118_v19, %v151_v20 }
  0xe4   :  { %v730_v22 = vpop.f32.mrf.mxu0 }
  0xe5   :  { %930 = vtanh.f32 %v152_v21 }
  0xe6   :  { %v154_v23 = vpop.f32.mrf.mxu0 }
  0xe8   :  { %v731_v24 = vpop.f32.mrf.mxu0 }
  0xf2   :  { %v931_v25 = vpop.eup %930 }
  0xf3   :  { %v158_v26 = vmul.f32 %v931_v25, %v931_v25 }
  0xf5   :  { %v159_v28 = vsub.f32 1.0, %v158_v26 }
  0xf7   :  { %v160_v29 = vmul.f32 %v1124_v27, %v159_v28 }
  0xf9   :  { %v161_v30 = vpack.c.bf16 %v160_v29, %v160_v29 }
  0xfb   :  { %749 = vmatmul.mubr.bf16.vlgmr.msra.gmra.mxu1 %v161_v30 }
  0xfc   :  { %773 = vmatpush3.bf16.msra.mxu1 %v1000_v4  ;;  %788 = vmatprep.mubr.msk.bf16.mxu1 %vm941_vm0, %v940_v0 }
  0xfd   :  { %774 = vmatprep.subr.bf16.mxu1 %v940_v0 }
 0x100   :  { %775 = vmatpush3.bf16.msra.mxu1 %v1011_v6 }
 0x101   :  { %776 = vmatprep.subr.bf16.mxu1 %v940_v0 }
 0x104   :  { %777 = vmatpush3.bf16.msra.mxu1 %v1076_v13 }
 0x105   :  { %778 = vmatprep.subr.bf16.mxu1 %v940_v0 }
 0x108   :  { %779 = vmatpush3.bf16.msra.mxu1 %v1083_v14 }
 0x109   :  { %780 = vmatprep.subr.bf16.mxu1 %v940_v0 }
 0x10c   :  { %781 = vmatpush3.bf16.msra.mxu1 %v1090_v15 }
 0x10d   :  { %782 = vmatprep.subr.bf16.mxu1 %v940_v0 }
 0x110   :  { %783 = vmatpush3.bf16.msra.mxu1 %v1097_v16 }
 0x111   :  { %784 = vmatprep.subr.bf16.mxu1 %v940_v0 }
 0x114   :  { %785 = vmatpush3.bf16.msra.mxu1 %v1104_v17 }
 0x115   :  { %786 = vmatprep.subr.bf16.mxu1 %v940_v0 }
 0x118   :  { %787 = vmatpush3.bf16.msra.mxu1 %v1111_v18 }
 0x119   :  { %812 = vmatprep.subr.bf16.mxu1 %v940_v0 }
 0x1bb   :  { %v244_v31 = vpop.f32.mrf.mxu1 }
 0x1bc   :  { %v250_v32 = vadd.f32 %v244_v31, %v1048_v11 }
 0x1bd   :  { %v750_v33 = vpop.f32.mrf.mxu1 }
 0x1be   :  { %v251_v34 = vpack.c.bf16 %v250_v32, %v250_v32 }
 0x1bf   :  { %v247_v35 = vpop.f32.mrf.mxu1 }
 0x1c0   :  { %769 = vmatmul.mubr.bf16.vlgmr.msra.gmra.mxu0 %v251_v34 }
 0x1c1   :  { %v751_v36 = vpop.f32.mrf.mxu1  ;;  %793 = vmatpush3.bf16.msra.mxu0 %v976_v1  ;;  %808 = vmatprep.mubr.msk.bf16.mxu0 %vm941_vm0, %v940_v0 }
 0x1c2   :  { %794 = vmatprep.subr.bf16.mxu0 %v940_v0 }
 0x1c5   :  { %795 = vmatpush3.bf16.msra.mxu0 %v987_v2 }
 0x1c6   :  { %796 = vmatprep.subr.bf16.mxu0 %v940_v0 }
 0x1c9   :  { %797 = vmatpush3.bf16.msra.mxu0 %v994_v3 }
 0x1ca   :  { %798 = vmatprep.subr.bf16.mxu0 %v940_v0 }
 0x1cd   :  { %799 = vmatpush3.bf16.msra.mxu0 %v1006_v5 }
 0x1ce   :  { %800 = vmatprep.subr.bf16.mxu0 %v940_v0 }
 0x1d1   :  { %801 = vmatpush3.bf16.msra.mxu0 %v1020_v7 }
 0x1d2   :  { %802 = vmatprep.subr.bf16.mxu0 %v940_v0 }
 0x1d5   :  { %803 = vmatpush3.bf16.msra.mxu0 %v1029_v8 }
 0x1d6   :  { %804 = vmatprep.subr.bf16.mxu0 %v940_v0 }
 0x1d9   :  { %805 = vmatpush3.bf16.msra.mxu0 %v1036_v9 }
 0x1da   :  { %806 = vmatprep.subr.bf16.mxu0 %v940_v0 }
 0x1dd   :  { %807 = vmatpush3.bf16.msra.mxu0 %v1043_v10 }
 0x1de   :  { %832 = vmatprep.subr.bf16.mxu0 %v940_v0 }
 0x280   :  { %v286_v37 = vpop.f32.mrf.mxu0 }
 0x281   :  { %v287_v38 = vadd.f32 %v1118_v19, %v286_v37 }
 0x282   :  { %v770_v39 = vpop.f32.mrf.mxu0 }
 0x283   :  { %932 = vtanh.f32 %v287_v38 }
 0x284   :  { %v289_v40 = vpop.f32.mrf.mxu0 }
 0x286   :  { %v771_v41 = vpop.f32.mrf.mxu0 }
 0x290   :  { %v933_v42 = vpop.eup %932 }
 0x291   :  { %v293_v43 = vmul.f32 %v933_v42, %v933_v42 }
 0x293   :  { %v294_v44 = vsub.f32 1.0, %v293_v43 }
 0x295   :  { %v295_v45 = vmul.f32 %v1124_v27, %v294_v44 }
 0x297   :  { %v296_v46 = vpack.c.bf16 %v295_v45, %v295_v45 }
 0x299   :  { %789 = vmatmul.mubr.bf16.vlgmr.msra.gmra.mxu1 %v296_v46 }
 0x29a   :  { %813 = vmatpush3.bf16.msra.mxu1 %v1000_v4  ;;  %828 = vmatprep.mubr.msk.bf16.mxu1 %vm941_vm0, %v940_v0 }
 0x29b   :  { %814 = vmatprep.subr.bf16.mxu1 %v940_v0 }
 0x29e   :  { %815 = vmatpush3.bf16.msra.mxu1 %v1011_v6 }
 0x29f   :  { %816 = vmatprep.subr.bf16.mxu1 %v940_v0 }
 0x2a2   :  { %817 = vmatpush3.bf16.msra.mxu1 %v1076_v13 }
 0x2a3   :  { %818 = vmatprep.subr.bf16.mxu1 %v940_v0 }
 0x2a6   :  { %819 = vmatpush3.bf16.msra.mxu1 %v1083_v14 }
 0x2a7   :  { %820 = vmatprep.subr.bf16.mxu1 %v940_v0 }
 0x2aa   :  { %821 = vmatpush3.bf16.msra.mxu1 %v1090_v15 }
 0x2ab   :  { %822 = vmatprep.subr.bf16.mxu1 %v940_v0 }
 0x2ae   :  { %823 = vmatpush3.bf16.msra.mxu1 %v1097_v16 }
 0x2af   :  { %824 = vmatprep.subr.bf16.mxu1 %v940_v0 }
 0x2b2   :  { %825 = vmatpush3.bf16.msra.mxu1 %v1104_v17 }
 0x2b3   :  { %826 = vmatprep.subr.bf16.mxu1 %v940_v0 }
 0x2b6   :  { %827 = vmatpush3.bf16.msra.mxu1 %v1111_v18 }
 0x2b7   :  { %852 = vmatprep.subr.bf16.mxu1 %v940_v0 }
 0x359   :  { %v331_v47 = vpop.f32.mrf.mxu1 }
 0x35a   :  { %v337_v48 = vadd.f32 %v331_v47, %v250_v32 }
 0x35b   :  { %v790_v49 = vpop.f32.mrf.mxu1 }
 0x35c   :  { %v338_v50 = vpack.c.bf16 %v337_v48, %v337_v48 }
 0x35d   :  { %v334_v51 = vpop.f32.mrf.mxu1 }
 0x35e   :  { %809 = vmatmul.mubr.bf16.vlgmr.msra.gmra.mxu0 %v338_v50 }
 0x35f   :  { %v791_v52 = vpop.f32.mrf.mxu1  ;;  %833 = vmatpush3.bf16.msra.mxu0 %v976_v1  ;;  %848 = vmatprep.mubr.msk.bf16.mxu0 %vm941_vm0, %v940_v0 }
 0x360   :  { %834 = vmatprep.subr.bf16.mxu0 %v940_v0 }
 0x363   :  { %835 = vmatpush3.bf16.msra.mxu0 %v987_v2 }
 0x364   :  { %836 = vmatprep.subr.bf16.mxu0 %v940_v0 }
 0x367   :  { %837 = vmatpush3.bf16.msra.mxu0 %v994_v3 }
 0x368   :  { %838 = vmatprep.subr.bf16.mxu0 %v940_v0 }
 0x36b   :  { %839 = vmatpush3.bf16.msra.mxu0 %v1006_v5 }
 0x36c   :  { %840 = vmatprep.subr.bf16.mxu0 %v940_v0 }
 0x36f   :  { %841 = vmatpush3.bf16.msra.mxu0 %v1020_v7 }
 0x370   :  { %842 = vmatprep.subr.bf16.mxu0 %v940_v0 }
 0x373   :  { %843 = vmatpush3.bf16.msra.mxu0 %v1029_v8 }
 0x374   :  { %844 = vmatprep.subr.bf16.mxu0 %v940_v0 }
 0x377   :  { %845 = vmatpush3.bf16.msra.mxu0 %v1036_v9 }
 0x378   :  { %846 = vmatprep.subr.bf16.mxu0 %v940_v0 }
 0x37b   :  { %847 = vmatpush3.bf16.msra.mxu0 %v1043_v10 }
 0x37c   :  { %872 = vmatprep.subr.bf16.mxu0 %v940_v0 }
 0x41e   :  { %v373_v53 = vpop.f32.mrf.mxu0 }
 0x41f   :  { %v374_v54 = vadd.f32 %v1118_v19, %v373_v53 }
 0x420   :  { %v810_v55 = vpop.f32.mrf.mxu0 }
 0x421   :  { %934 = vtanh.f32 %v374_v54 }
 0x422   :  { %v376_v56 = vpop.f32.mrf.mxu0 }
 0x424   :  { %v811_v57 = vpop.f32.mrf.mxu0 }
 0x42e   :  { %v935_v58 = vpop.eup %934 }
 0x42f   :  { %v380_v59 = vmul.f32 %v935_v58, %v935_v58 }
 0x431   :  { %v381_v60 = vsub.f32 1.0, %v380_v59 }
 0x433   :  { %v382_v61 = vmul.f32 %v1124_v27, %v381_v60 }
 0x435   :  { %v383_v62 = vpack.c.bf16 %v382_v61, %v382_v61 }
 0x437   :  { %829 = vmatmul.mubr.bf16.vlgmr.msra.gmra.mxu1 %v383_v62 }
 0x438   :  { %853 = vmatpush3.bf16.msra.mxu1 %v1000_v4  ;;  %868 = vmatprep.mubr.msk.bf16.mxu1 %vm941_vm0, %v940_v0 }
 0x439   :  { %854 = vmatprep.subr.bf16.mxu1 %v940_v0 }
 0x43c   :  { %855 = vmatpush3.bf16.msra.mxu1 %v1011_v6 }
 0x43d   :  { %856 = vmatprep.subr.bf16.mxu1 %v940_v0 }
 0x440   :  { %857 = vmatpush3.bf16.msra.mxu1 %v1076_v13 }
 0x441   :  { %858 = vmatprep.subr.bf16.mxu1 %v940_v0 }
 0x444   :  { %859 = vmatpush3.bf16.msra.mxu1 %v1083_v14 }
 0x445   :  { %860 = vmatprep.subr.bf16.mxu1 %v940_v0 }
 0x448   :  { %861 = vmatpush3.bf16.msra.mxu1 %v1090_v15 }
 0x449   :  { %862 = vmatprep.subr.bf16.mxu1 %v940_v0 }
 0x44c   :  { %863 = vmatpush3.bf16.msra.mxu1 %v1097_v16 }
 0x44d   :  { %864 = vmatprep.subr.bf16.mxu1 %v940_v0 }
 0x450   :  { %865 = vmatpush3.bf16.msra.mxu1 %v1104_v17 }
 0x451   :  { %866 = vmatprep.subr.bf16.mxu1 %v940_v0 }
 0x454   :  { %867 = vmatpush3.bf16.msra.mxu1 %v1111_v18 }
 0x455   :  { %892 = vmatprep.subr.bf16.mxu1 %v940_v0 }
 0x4f7   :  { %v418_v63 = vpop.f32.mrf.mxu1 }
 0x4f8   :  { %v424_v11 = vadd.f32 %v418_v63, %v337_v48 }
 0x4f9   :  { %v830_v12 = vpop.f32.mrf.mxu1 }
 0x4fa   :  { %v425_v20 = vpack.c.bf16 %v424_v11, %v424_v11 }
 0x4fb   :  { %v421_v21 = vpop.f32.mrf.mxu1 }
 0x4fc   :  { %849 = vmatmul.mubr.bf16.vlgmr.msra.gmra.mxu0 %v425_v20 }
 0x4fd   :  { %v831_v22 = vpop.f32.mrf.mxu1  ;;  %873 = vmatpush3.bf16.msra.mxu0 %v976_v1  ;;  %888 = vmatprep.mubr.msk.bf16.mxu0 %vm941_vm0, %v940_v0 }
 0x4fe   :  { %874 = vmatprep.subr.bf16.mxu0 %v940_v0 }
 0x501   :  { %875 = vmatpush3.bf16.msra.mxu0 %v987_v2 }
 0x502   :  { %876 = vmatprep.subr.bf16.mxu0 %v940_v0 }
 0x505   :  { %877 = vmatpush3.bf16.msra.mxu0 %v994_v3 }
 0x506   :  { %878 = vmatprep.subr.bf16.mxu0 %v940_v0 }
 0x509   :  { %879 = vmatpush3.bf16.msra.mxu0 %v1006_v5 }
 0x50a   :  { %880 = vmatprep.subr.bf16.mxu0 %v940_v0 }
 0x50d   :  { %881 = vmatpush3.bf16.msra.mxu0 %v1020_v7 }
 0x50e   :  { %882 = vmatprep.subr.bf16.mxu0 %v940_v0 }
 0x511   :  { %883 = vmatpush3.bf16.msra.mxu0 %v1029_v8 }
 0x512   :  { %884 = vmatprep.subr.bf16.mxu0 %v940_v0 }
 0x515   :  { %885 = vmatpush3.bf16.msra.mxu0 %v1036_v9 }
 0x516   :  { %886 = vmatprep.subr.bf16.mxu0 %v940_v0 }
 0x519   :  { %887 = vmatpush3.bf16.msra.mxu0 %v1043_v10 }
 0x5bc   :  { %v460_v1 = vpop.f32.mrf.mxu0 }
 0x5bd   :  { %v461_v2 = vadd.f32 %v1118_v19, %v460_v1 }
 0x5be   :  { %v850_v3 = vpop.f32.mrf.mxu0 }
 0x5bf   :  { %936 = vtanh.f32 %v461_v2 }
 0x5c0   :  { %v463_v5 = vpop.f32.mrf.mxu0 }
 0x5c2   :  { %v851_v23 = vpop.f32.mrf.mxu0 }
 0x5cc   :  { %v937_v7 = vpop.eup %936 }
 0x5cd   :  { %v467_v24 = vmul.f32 %v937_v7, %v937_v7 }
 0x5cf   :  { %v468_v25 = vsub.f32 1.0, %v467_v24 }
 0x5d1   :  { %v469_v8 = vmul.f32 %v1124_v27, %v468_v25 }
 0x5d3   :  { %v470_v26 = vpack.c.bf16 %v469_v8, %v469_v8 }
 0x5d5   :  { %869 = vmatmul.mubr.bf16.vlgmr.msra.gmra.mxu1 %v470_v26 }
 0x5d6   :  { %893 = vmatpush3.bf16.msra.mxu1 %v1000_v4  ;;  %908 = vmatprep.mubr.msk.bf16.mxu1 %vm941_vm0, %v940_v0 }
 0x5d7   :  { %894 = vmatprep.subr.bf16.mxu1 %v940_v0 }
 0x5da   :  { %895 = vmatpush3.bf16.msra.mxu1 %v1011_v6 }
 0x5db   :  { %896 = vmatprep.subr.bf16.mxu1 %v940_v0 }
 0x5de   :  { %897 = vmatpush3.bf16.msra.mxu1 %v1076_v13 }
 0x5df   :  { %898 = vmatprep.subr.bf16.mxu1 %v940_v0 }
 0x5e2   :  { %899 = vmatpush3.bf16.msra.mxu1 %v1083_v14 }
 0x5e3   :  { %900 = vmatprep.subr.bf16.mxu1 %v940_v0 }
 0x5e6   :  { %901 = vmatpush3.bf16.msra.mxu1 %v1090_v15 }
 0x5e7   :  { %902 = vmatprep.subr.bf16.mxu1 %v940_v0 }
 0x5ea   :  { %903 = vmatpush3.bf16.msra.mxu1 %v1097_v16 }
 0x5eb   :  { %904 = vmatprep.subr.bf16.mxu1 %v940_v0 }
 0x5ee   :  { %905 = vmatpush3.bf16.msra.mxu1 %v1104_v17 }
 0x5ef   :  { %906 = vmatprep.subr.bf16.mxu1 %v940_v0 }
 0x5f2   :  { %907 = vmatpush3.bf16.msra.mxu1 %v1111_v18 }
 0x695   :  { %v505_v4 = vpop.f32.mrf.mxu1 }
 0x696   :  { %v511_v6 = vadd.f32 %v505_v4, %v424_v11 }
 0x697   :  { %v870_v9 = vpop.f32.mrf.mxu1 }
 0x698   :  { %v512_v10 = vpack.c.bf16 %v511_v6, %v511_v6 }
 0x699   :  { %v508_v13 = vpop.f32.mrf.mxu1 }
 0x69a   :  { %889 = vmatmul.mubr.bf16.vlgmr.msra.gmra.mxu0 %v512_v10 }
 0x69b   :  { %v871_v14 = vpop.f32.mrf.mxu1 }
 0x75a   :  { %v547_v15 = vpop.f32.mrf.mxu0 }
 0x75b   :  { %v548_v28 = vadd.f32 %v1118_v19, %v547_v15 }
 0x75c   :  { %v890_v29 = vpop.f32.mrf.mxu0 }
 0x75d   :  { %938 = vtanh.f32 %v548_v28 }
 0x75e   :  { %v550_v16 = vpop.f32.mrf.mxu0 }
 0x760   :  { %v891_v30 = vpop.f32.mrf.mxu0 }
 0x76a   :  { %v939_v31 = vpop.eup %938 }
 0x76b   :  { %v554_v17 = vmul.f32 %v939_v31, %v939_v31 }
 0x76d   :  { %v555_v32 = vsub.f32 1.0, %v554_v17 }
 0x76f   :  { %v556_v0 = vmul.f32 %v1124_v27, %v555_v32 }
 0x771   :  { %v557_v18 = vpack.c.bf16 %v556_v0, %v556_v0 }
 0x773   :  { %909 = vmatmul.mubr.bf16.vlgmr.msra.gmra.mxu1 %v557_v18 }
 0x833   :  { %v592_v33 = vpop.f32.mrf.mxu1 }
 0x834   :  { %v598_v34 = vadd.f32 %v592_v33, %v511_v6 }
 0x835   :  { %v910_v35 = vpop.f32.mrf.mxu1 }
 0x836   :  { %599 = vst [vmem:[%s1268_s5] sm:$0xff] %v598_v34 }
 0x837   :  { %v595_v36 = vpop.f32.mrf.mxu1 }
 0x839   :  { %v911_v19 = vpop.f32.mrf.mxu1 }

</bundles_post_ra>
